<compile_context>
chip_gen: v6e
topology: v6e:2x2x1
jax: 0.10.0
libtpu: 0.0.40
codegen_flags: <defaults>
</compile_context>

<pallas_src>
from functools import partial

import jax
import jax.numpy as jnp
from jax.experimental import pallas as pl
from jax.experimental.pallas import tpu as pltpu

BN_EPS = 1e-5


# ----------------------------------------------------------------------------
# helpers
# ----------------------------------------------------------------------------
def _round_up(x, m):
    return ((x + m - 1) // m) * m


def _vmem_cap_bytes():
    """~70% of physical VMEM for this generation; conservative fallback (v7x)."""
    phys = None
    try:
        phys = getattr(pltpu.get_tpu_info(), "vmem_capacity_bytes", None)
    except Exception:
        phys = None
    if not phys:
        phys = 64 << 20            # v7x per-TC physical (smallest of v5e/v6e/v7x)
    return int(phys) * 7 // 10


def _vmem_limit_bytes(block_bytes, cap):
    need = 2 * int(block_bytes) + (2 << 20)   # double-buffered blocks + headroom
    return int(min(max(need, 16 << 20), cap))


def _pick_tile_n(cout):
    """Channel tile: full Cout if small, else a 128-aligned divisor <= 256."""
    if cout <= 256:
        return cout
    for tn in (256, 128):
        if cout % tn == 0:
            return tn
    return cout


# ----------------------------------------------------------------------------
# Pass 1: Conv(3x3 as one big-K im2col matmul) + bias + ReLU, plus per-tile
#         BatchNorm partial statistics (sum, sum-of-squares), padded rows masked.
# ----------------------------------------------------------------------------
def _conv_relu_stats_kernel(x_ref, w_ref, b_ref, y_ref, stats_ref, *, valid_rows):
    # x_ref: (TM, 9*Cin) bf16, w_ref: (9*Cin, TN) bf16, b_ref: (1, TN) f32
    acc = jnp.dot(x_ref[...], w_ref[...], preferred_element_type=jnp.float32)
    acc = jnp.maximum(acc + b_ref[...], 0.0)          # bias + ReLU (f32)
    y_ref[...] = acc.astype(y_ref.dtype)
    if valid_rows is not None:                        # static: mask padded tail rows
        row0 = pl.program_id(0) * acc.shape[0]
        rows = row0 + jax.lax.broadcasted_iota(jnp.int32, acc.shape, 0)
        acc = jnp.where(rows < valid_rows, acc, 0.0)
    s1 = jnp.sum(acc, axis=0, keepdims=True)          # (1, TN)
    s2 = jnp.sum(acc * acc, axis=0, keepdims=True)    # (1, TN)
    stats_ref[...] = jnp.concatenate([s1, s2], axis=0)[None, :, :]   # (1, 2, TN)


# ----------------------------------------------------------------------------
# Pass 2: pure streaming per-channel FMA (scale/shift precomputed in wrapper).
# ----------------------------------------------------------------------------
def _bn_apply_kernel(y_ref, scale_ref, shift_ref, o_ref):
    o_ref[...] = (y_ref[...] * scale_ref[...] + shift_ref[...]).astype(o_ref.dtype)


# ----------------------------------------------------------------------------
# ConvReluBatchPack.forward : conv -> relu -> batch_norm   (NCHW in / NCHW out)
# ----------------------------------------------------------------------------
def conv_relu_bn_forward(x_nchw, w_oihw, b, gamma, beta, *,
                         tile_m=512, tile_m2=1024):
    N, Cin, H, W = x_nchw.shape
    Cout = w_oihw.shape[0]
    M = N * H * W
    K9 = 9 * Cin
    out_dtype = x_nchw.dtype

    # --- wrapper glue: NCHW -> NHWC (bf16), pad=1, im2col (M, 9*Cin) ----------
    x_nhwc = jnp.transpose(x_nchw, (0, 2, 3, 1)).astype(jnp.bfloat16)
    xp = jnp.pad(x_nhwc, ((0, 0), (1, 1), (1, 1), (0, 0)))
    taps = [xp[:, dy:dy + H, dx:dx + W, :] for dy in range(3) for dx in range(3)]
    xcol = jnp.concatenate(taps, axis=-1).reshape(M, K9)
    # OIHW -> (ky, kx, Cin, Cout) -> (9*Cin, Cout), matching tap order above
    w = jnp.transpose(w_oihw, (2, 3, 1, 0)).reshape(K9, Cout).astype(jnp.bfloat16)
    b2 = b.reshape(1, Cout).astype(jnp.float32)

    # --- tiling: pad M so row tiles can be roofline/MXU-friendly --------------
    tm1 = min(tile_m, _round_up(M, 256))
    Mp = _round_up(M, tm1)
    if Mp != M:
        xcol = jnp.pad(xcol, ((0, Mp - M), (0, 0)))
    num_m = Mp // tm1
    tn = _pick_tile_n(Cout)
    num_n = Cout // tn

    F32, BF16 = 4, 2
    cap = _vmem_cap_bytes()

    # --- pass 1: conv + bias + relu + per-tile BN partials ---------------------
    blk1 = (tm1 * K9 * BF16 + K9 * tn * BF16 + tn * F32
            + tm1 * tn * F32 + 2 * tn * F32)
    ce1 = pl.CostEstimate(
        flops=2 * Mp * K9 * Cout + 4 * Mp * Cout,
        transcendentals=0,
        bytes_accessed=(BF16 * (Mp * K9 + num_m * K9 * Cout)
                        + F32 * (Cout + Mp * Cout + 2 * num_m * Cout)),
    )
    y_act, stats = pl.pallas_call(
        partial(_conv_relu_stats_kernel,
                valid_rows=(M if Mp != M else None)),
        out_shape=(
            jax.ShapeDtypeStruct((Mp, Cout), jnp.float32),
            jax.ShapeDtypeStruct((num_m, 2, Cout), jnp.float32),
        ),
        grid=(num_m, num_n),
        in_specs=[
            pl.BlockSpec((tm1, K9), lambda i, j: (i, 0)),
            pl.BlockSpec((K9, tn), lambda i, j: (0, j)),
            pl.BlockSpec((1, tn), lambda i, j: (0, j)),
        ],
        out_specs=(
            pl.BlockSpec((tm1, tn), lambda i, j: (i, j)),
            pl.BlockSpec((1, 2, tn), lambda i, j: (i, 0, j)),
        ),
        compiler_params=pltpu.CompilerParams(
            dimension_semantics=("parallel", "parallel"),
            vmem_limit_bytes=_vmem_limit_bytes(blk1, cap),
        ),
        cost_estimate=ce1,
    )(xcol, w, b2)

    # --- hoisted BN reduction: fold tiny partials into scale / shift ----------
    sums = jnp.sum(stats, axis=0)                 # (2, Cout), f32
    mean = sums[0] * (1.0 / M)
    ex2 = sums[1] * (1.0 / M)
    var = jnp.maximum(ex2 - mean * mean, 0.0)     # guard f32 cancellation
    scale_v = gamma.astype(jnp.float32) * jax.lax.rsqrt(var + BN_EPS)
    shift_v = beta.astype(jnp.float32) - mean * scale_v
    scale = scale_v.reshape(1, Cout)
    shift = shift_v.reshape(1, Cout)

    # --- pass 2: streaming FMA with a larger, decoupled row tile ---------------
    k = max(min(tile_m2 // tm1, num_m), 1)
    while k > 1 and num_m % k != 0:
        k -= 1
    tm2 = k * tm1
    num_m2 = Mp // tm2
    blk2 = 2 * tm2 * Cout * F32 + 2 * Cout * F32
    ce2 = pl.CostEstimate(
        flops=2 * Mp * Cout,
        transcendentals=0,
        bytes_accessed=F32 * (2 * Mp * Cout + 2 * Cout),
    )
    out_flat = pl.pallas_call(
        _bn_apply_kernel,
        out_shape=jax.ShapeDtypeStruct((Mp, Cout), out_dtype),
        grid=(num_m2,),
        in_specs=[
            pl.BlockSpec((tm2, Cout), lambda i: (i, 0)),
            pl.BlockSpec((1, Cout), lambda i: (0, 0)),
            pl.BlockSpec((1, Cout), lambda i: (0, 0)),
        ],
        out_specs=pl.BlockSpec((tm2, Cout), lambda i: (i, 0)),
        compiler_params=pltpu.CompilerParams(
            dimension_semantics=("parallel",),
            vmem_limit_bytes=_vmem_limit_bytes(blk2, cap),
        ),
        cost_estimate=ce2,
    )(y_act, scale, shift)

    # --- wrapper metadata: drop row padding, back to PyTorch NCHW --------------
    return jnp.transpose(out_flat[:M].reshape(N, H, W, Cout), (0, 3, 1, 2))


# ----------------------------------------------------------------------------
# Pure-JAX reference (PyTorch semantics, NCHW) for verification
# ----------------------------------------------------------------------------
def _ref_forward(x, w, b, g, bt):
    y = jax.lax.conv_general_dilated(
        x, w, window_strides=(1, 1), padding=((1, 1), (1, 1)),
        dimension_numbers=("NCHW", "OIHW", "NCHW"),
        precision=jax.lax.Precision.HIGHEST)
    y = y + b[None, :, None, None]
    y = jnp.maximum(y, 0.0)
    mean = jnp.mean(y, axis=(0, 2, 3), keepdims=True)
    var = jnp.mean((y - mean) ** 2, axis=(0, 2, 3), keepdims=True)
    y = (y - mean) * jax.lax.rsqrt(var + BN_EPS)
    return y * g[None, :, None, None] + bt[None, :, None, None]


if __name__ == "__main__":
    def run_case(key, N, Cin, H, W, Cout):
        kw, kb, kx = jax.random.split(key, 3)
        # mimic PyTorch Conv2d default init: U(-1/sqrt(fan_in), 1/sqrt(fan_in))
        bound = 1.0 / jnp.sqrt(float(Cin * 9))
        w = jax.random.uniform(kw, (Cout, Cin, 3, 3), jnp.float32, -bound, bound)
        b = jax.random.uniform(kb, (Cout,), jnp.float32, -bound, bound)
        gamma = jnp.ones((Cout,), jnp.float32)   # BatchNorm2d default weight
        beta = jnp.zeros((Cout,), jnp.float32)   # BatchNorm2d default bias
        x = jax.random.normal(kx, (N, Cin, H, W), jnp.float32)

        out = jax.block_until_ready(conv_relu_bn_forward(x, w, b, gamma, beta))
        assert out.shape == (N, Cout, H, W), out.shape

        # Tight check vs a reference that uses the same bf16-rounded matmul
        # operands (isolates kernel math from the intentional quantization).
        xq = x.astype(jnp.bfloat16).astype(jnp.float32)
        wq = w.astype(jnp.bfloat16).astype(jnp.float32)
        ref_q = _ref_forward(xq, wq, b, gamma, beta)
        err_q = float(jnp.max(jnp.abs(out - ref_q)))
        assert jnp.allclose(out, ref_q, atol=2e-3, rtol=2e-3), f"q-ref err {err_q}"

        # Loose check vs the exact f32 reference (bf16 operand rounding only).
        ref = _ref_forward(x, w, b, gamma, beta)
        err = float(jnp.max(jnp.abs(out - ref)))
        assert jnp.allclose(out, ref, atol=8e-2, rtol=8e-2), f"f32-ref err {err}"

    key = jax.random.PRNGKey(0)
    k1, k2 = jax.random.split(key)
    run_case(k1, 2, 4, 16, 16, 8)    # tile divides M exactly
    run_case(k2, 1, 3, 13, 13, 5)    # exercises M padding + stats masking path
    print("KERNEL_OK")
</pallas_src>

<mosaic_0001>
module attributes {stable_mosaic.version = 11 : i64} {
  func.func @_conv_relu_stats_kernel(%arg0: i32, %arg1: i32, %arg2: memref<512x36xbf16, #tpu.memory_space<vmem>>, %arg3: memref<36x8xbf16, #tpu.memory_space<vmem>>, %arg4: memref<1x8xf32, #tpu.memory_space<vmem>>, %arg5: memref<512x8xf32, #tpu.memory_space<vmem>>, %arg6: memref<1x2x8xf32, #tpu.memory_space<vmem>>) attributes {dimension_semantics = [#tpu.dimension_semantics<parallel>, #tpu.dimension_semantics<parallel>], iteration_bounds = array<i64: 1, 1>, scalar_prefetch = 0 : i64, scratch_operands = 0 : i64, tpu.core_type = #tpu.core_type<tc>, window_params = [{transform_indices = @transform_0, window_bounds = array<i64: 512, 36>}, {transform_indices = @transform_1, window_bounds = array<i64: 36, 8>}, {transform_indices = @transform_2, window_bounds = array<i64: 1, 8>}, {transform_indices = @transform_3, window_bounds = array<i64: 512, 8>}, {transform_indices = @transform_4, window_bounds = array<i64: 1, 2, 8>}]} {
    %c0 = arith.constant 0 : index
    %c0_0 = arith.constant 0 : index
    %0 = vector.load %arg2[%c0, %c0_0] : memref<512x36xbf16, #tpu.memory_space<vmem>>, vector<512x36xbf16>
    %c0_1 = arith.constant 0 : index
    %c0_2 = arith.constant 0 : index
    %1 = vector.load %arg3[%c0_1, %c0_2] : memref<36x8xbf16, #tpu.memory_space<vmem>>, vector<36x8xbf16>
    %cst = arith.constant dense<0.000000e+00> : vector<512x8xf32>
    %2 = tpu.matmul %0, %1, %cst {dimension_numbers = #tpu.dot_dimension_numbers<[1], [0], [0], [1], [0, 0, 1, 1], [], []>} : vector<512x36xbf16>, vector<36x8xbf16>, vector<512x8xf32> -> vector<512x8xf32>
    %c0_3 = arith.constant 0 : index
    %c0_4 = arith.constant 0 : index
    %3 = vector.load %arg4[%c0_3, %c0_4] : memref<1x8xf32, #tpu.memory_space<vmem>>, vector<1x8xf32>
    %4 = vector.broadcast %3 : vector<1x8xf32> to vector<512x8xf32>
    %5 = arith.addf %2, %4 : vector<512x8xf32>
    %cst_5 = arith.constant 0.000000e+00 : f32
    %6 = vector.broadcast %cst_5 : f32 to vector<512x8xf32>
    %7 = arith.maximumf %5, %6 : vector<512x8xf32>
    %c0_6 = arith.constant 0 : index
    %c0_7 = arith.constant 0 : index
    %8 = vector.load %arg5[%c0_6, %c0_7] : memref<512x8xf32, #tpu.memory_space<vmem>>, vector<512x8xf32>
    tpu.vector_store %arg5[%c0_6, %c0_7], %7 {strides = array<i32>} : memref<512x8xf32, #tpu.memory_space<vmem>>, vector<512x8xf32>,
    %cst_8 = arith.constant dense<0.000000e+00> : vector<8xf32>
    %9 = vector.multi_reduction <add>, %7, %cst_8 [0] : vector<512x8xf32> to vector<8xf32>
    %10 = vector.shape_cast %9 : vector<8xf32> to vector<1x8xf32>
    %11 = arith.mulf %7, %7 : vector<512x8xf32>
    %cst_9 = arith.constant dense<0.000000e+00> : vector<8xf32>
    %12 = vector.multi_reduction <add>, %11, %cst_9 [0] : vector<512x8xf32> to vector<8xf32>
    %13 = vector.shape_cast %12 : vector<8xf32> to vector<1x8xf32>
    %14 = tpu.concatenate %10, %13 in 0 : vector<1x8xf32>, vector<1x8xf32> -> vector<2x8xf32>
    %15 = vector.shape_cast %14 : vector<2x8xf32> to vector<1x2x8xf32>
    %c0_10 = arith.constant 0 : index
    %c0_11 = arith.constant 0 : index
    %c0_12 = arith.constant 0 : index
    %16 = vector.load %arg6[%c0_10, %c0_11, %c0_12] : memref<1x2x8xf32, #tpu.memory_space<vmem>>, vector<1x2x8xf32>
    tpu.vector_store %arg6[%c0_10, %c0_11, %c0_12], %15 {strides = array<i32>} : memref<1x2x8xf32, #tpu.memory_space<vmem>>, vector<1x2x8xf32>,
    return
  }
  func.func @transform_0(%arg0: i32, %arg1: i32) -> (i32, i32) {
    %c0_i32 = arith.constant 0 : i32
    %c0_i32_0 = arith.constant 0 : i32
    return %arg0, %c0_i32 : i32, i32
  }
  func.func @transform_1(%arg0: i32, %arg1: i32) -> (i32, i32) {
    %c0_i32 = arith.constant 0 : i32
    %c0_i32_0 = arith.constant 0 : i32
    return %c0_i32, %arg1 : i32, i32
  }
  func.func @transform_2(%arg0: i32, %arg1: i32) -> (i32, i32) {
    %c0_i32 = arith.constant 0 : i32
    %c0_i32_0 = arith.constant 0 : i32
    return %c0_i32, %arg1 : i32, i32
  }
  func.func @transform_3(%arg0: i32, %arg1: i32) -> (i32, i32) {
    %c0_i32 = arith.constant 0 : i32
    return %arg0, %arg1 : i32, i32
  }
  func.func @transform_4(%arg0: i32, %arg1: i32) -> (i32, i32, i32) {
    %c0_i32 = arith.constant 0 : i32
    %c0_i32_0 = arith.constant 0 : i32
    return %arg0, %c0_i32, %arg1 : i32, i32, i32
  }
}

</mosaic_0001>

<bundles_post_ra>
// kernel: tpu_custom_call.1
= control target key start
LH: loop header
LB: loop body
LE: loop exit
PB: predicated region body
PF: predicated region fallthrough
CT: control target
= control target key end

     0   :  { %vm366_vm0 = vcmask 1041408   ;;  %vm269_vm1 = vcmask 293888   ;;  %s2259_s0 = inlined_call_operand.vmem [shape: bf16[512,36], index: 0, kind: input, shape index: {}]   ;;  %s2260_s1 = inlined_call_operand.vmem [shape: bf16[36,8], index: 1, kind: input, shape index: {}]   ;;  %s2261_s2 = inlined_call_operand.vmem [shape: f32[1,8], index: 2, kind: input, shape index: {}]   ;;  %s2262_s3 = inlined_call_operand.vmem [shape: f32[512,8], index: 3, kind: output, shape index: {0}]   ;;  %s2263_s4 = inlined_call_operand.hbm [shape: f32[1,2,8], index: 4, kind: output, shape index: {1}]  }
   0x1   :  { %v1322_v0 = vld [vmem:[%s2260_s1 + $0x10] ss:$0 sps:$4 sm:$0x33]   ;;  %v1323_v1 = vld [vmem:[%s2260_s1 + $0x8] sm:$0xff]   ;;  %v1325_v3 = vld [vmem:[%s2259_s0] sm:$0xff]  }
   0x2   :  { %1319 = vmatprep.subr.msk.bf16.mxu0 %vm366_vm0, %v1322_v0  ;;  %v368_v2 = vsel %vm366_vm0, %v1322_v0, 0  ;;  %1320 = vmatprep.subr.msk.bf16.mxu1 %vm366_vm0, %v1322_v0  ;;  %v1324_v4 = vld [vmem:[%s2260_s1] sm:$0xff]   ;;  %v1326_v5 = vld [vmem:[%s2259_s0 + $0x8] sm:$0xff]   ;;  %v1327_v6 = vld [vmem:[%s2259_s0 + $0x10] sm:$0xff]  }
   0x3   :  { %1244 = vmatpush3.bf16.msra.mxu0 %v368_v2  ;;  %1316 = vmatpush3.bf16.msra.mxu1 %v368_v2  ;;  %v1328_v7 = vld [vmem:[%s2259_s0 + $0x18] sm:$0xff]   ;;  %v1329_v8 = vld [vmem:[%s2259_s0 + $0x20] sm:$0xff]   ;;  %v1342_v10 = vld [vmem:[%s2259_s0 + $0x88] sm:$0xff]  }
   0x4   :  { %1245 = vmatprep.subr.bf16.mxu0 %v1323_v1  ;;  %1314 = vmatprep.subr.bf16.mxu1 %v1323_v1  ;;  %v1341_v9 = vld [vmem:[%s2259_s0 + $0x80] sm:$0xff]   ;;  %v1343_v11 = vld [vmem:[%s2259_s0 + $0x90] sm:$0xff]   ;;  %v1330_v12 = vld [vmem:[%s2259_s0 + $0x28] sm:$0xff]  }
   0x5   :  { %1249 = vmatprep.mubr.msk.bf16.mxu0 %vm269_vm1, %v1325_v3  ;;  %1281 = vmatprep.mubr.msk.bf16.mxu1 %vm269_vm1, %v1341_v9  ;;  %v1331_v13 = vld [vmem:[%s2259_s0 + $0x30] sm:$0xff]   ;;  %v1344_v14 = vld [vmem:[%s2259_s0 + $0x98] sm:$0xff]   ;;  %v1345_v15 = vld [vmem:[%s2259_s0 + $0xa0] sm:$0xff]  }
   0x6   :  { %v1332_v16 = vld [vmem:[%s2259_s0 + $0x38] sm:$0xff]   ;;  %v1346_v17 = vld [vmem:[%s2259_s0 + $0xa8] sm:$0xff]   ;;  %v1333_v18 = vld [vmem:[%s2259_s0 + $0x40] sm:$0xff]  }
   0x7   :  { %1246 = vmatpush3.bf16.msra.mxu0 %v1323_v1  ;;  %1317 = vmatpush3.bf16.msra.mxu1 %v1323_v1  ;;  %v1347_v19 = vld [vmem:[%s2259_s0 + $0xb0] sm:$0xff]  }
   0x8   :  { %1247 = vmatprep.subr.bf16.mxu0 %v1324_v4  ;;  %1315 = vmatprep.subr.bf16.mxu1 %v1324_v4 }
   0xb   :  { %1248 = vmatpush3.bf16.msra.mxu0 %v1324_v4  ;;  %1318 = vmatpush3.bf16.msra.mxu1 %v1324_v4 }
   0xe   :  { %1250 = vmatmul.mubr.msk.bf16.vlgmr.msra.gmra.mxu0 %vm269_vm1, %v1326_v5  ;;  %1282 = vmatmul.mubr.msk.bf16.vlgmr.msra.gmra.mxu1 %vm269_vm1, %v1342_v10 }
   0xf   :  { %1253 = vmatprep.mubr.msk.bf16.mxu0 %vm269_vm1, %v1327_v6  ;;  %1285 = vmatprep.mubr.msk.bf16.mxu1 %vm269_vm1, %v1343_v11 }
  0x16   :  { %1254 = vmatmul.mubr.msk.bf16.gmra.mxu0 %vm269_vm1, %v1328_v7  ;;  %1286 = vmatmul.mubr.msk.bf16.gmra.mxu1 %vm269_vm1, %v1344_v14 }
  0x17   :  { %1257 = vmatprep.mubr.msk.bf16.mxu0 %vm269_vm1, %v1329_v8  ;;  %1289 = vmatprep.mubr.msk.bf16.mxu1 %vm269_vm1, %v1345_v15 }
  0x1e   :  { %1258 = vmatmul.mubr.msk.bf16.gmra.mxu0 %vm269_vm1, %v1330_v12 }
  0x1f   :  { %1261 = vmatprep.mubr.msk.bf16.mxu0 %vm269_vm1, %v1331_v13 }
  0x20   :  { %10 = vsyncpa [#allocation3], 0  ;;  %1290 = vmatmul.mubr.msk.bf16.gmra.mxu1 %vm269_vm1, %v1346_v17  ;;  %v1334_v20 = vld [vmem:[%s2259_s0 + $0x48] sm:$0xff]   ;;  %v1348_v21 = vld [vmem:[%s2259_s0 + $0xb8] sm:$0xff]   ;;  %vm723_vm2 = vcmask 64512   ;;  %vm1118_vm3 = vcmask 1040384  }
  0x21   :  { %1293 = vmatprep.mubr.msk.bf16.mxu1 %vm269_vm1, %v1347_v19  ;;  %v1335_v22 = vld [vmem:[%s2259_s0 + $0x50] sm:$0xff]   ;;  %v1349_v23 = vld [vmem:[%s2259_s0 + $0xc0] sm:$0xff]   ;;  %v1336_v24 = vld [vmem:[%s2259_s0 + $0x58] sm:$0xff]   ;;  %vm1120_vm4 = vcmask 58368  }
  0x22   :  { %v1350_v25 = vld [vmem:[%s2259_s0 + $0xc8] sm:$0xff]   ;;  %v1337_v26 = vld [vmem:[%s2259_s0 + $0x60] sm:$0xff]   ;;  %v1351_v27 = vld [vmem:[%s2259_s0 + $0xd0] sm:$0xff]  }
  0x23   :  { %v1338_v28 = vld [vmem:[%s2259_s0 + $0x68] sm:$0xff]   ;;  %v1352_v29 = vld [vmem:[%s2259_s0 + $0xd8] sm:$0xff]   ;;  %v1339_v30 = vld [vmem:[%s2259_s0 + $0x70] sm:$0xff]  }
  0x24   :  { %v1353_v31 = vld [vmem:[%s2259_s0 + $0xe0] sm:$0xff]   ;;  %v1340_v32 = vld [vmem:[%s2259_s0 + $0x78] sm:$0xff]   ;;  %v1354_v33 = vld [vmem:[%s2259_s0 + $0xe8] sm:$0xff]  }
  0x25   :  { %v1355_v34 = vld [vmem:[%s2259_s0 + $0xf0] sm:$0xff]   ;;  %v1356_v35 = vld [vmem:[%s2259_s0 + $0xf8] sm:$0xff]   ;;  %v1545_v36 = vld [vmem:[%s2261_s2] ss:$0 sm:$0xff] }
  0x26   :  { %1262 = vmatmul.mubr.msk.bf16.gmra.mxu0 %vm269_vm1, %v1332_v16 }
  0x27   :  { %1265 = vmatprep.mubr.msk.bf16.mxu0 %vm269_vm1, %v1333_v18 }
  0x28   :  { %1294 = vmatmul.mubr.msk.bf16.gmra.mxu1 %vm269_vm1, %v1348_v21 }
  0x29   :  { %1297 = vmatprep.mubr.msk.bf16.mxu1 %vm269_vm1, %v1349_v23 }
  0x2e   :  { %1266 = vmatmul.mubr.msk.bf16.gmra.mxu0 %vm269_vm1, %v1334_v20 }
  0x2f   :  { %1269 = vmatprep.mubr.msk.bf16.mxu0 %vm269_vm1, %v1335_v22 }
  0x30   :  { %1298 = vmatmul.mubr.msk.bf16.gmra.mxu1 %vm269_vm1, %v1350_v25 }
  0x31   :  { %1301 = vmatprep.mubr.msk.bf16.mxu1 %vm269_vm1, %v1351_v27 }
  0x36   :  { %1270 = vmatmul.mubr.msk.bf16.gmra.mxu0 %vm269_vm1, %v1336_v24 }
  0x37   :  { %1273 = vmatprep.mubr.msk.bf16.mxu0 %vm269_vm1, %v1337_v26 }
  0x38   :  { %1302 = vmatmul.mubr.msk.bf16.gmra.mxu1 %vm269_vm1, %v1352_v29 }
  0x39   :  { %1305 = vmatprep.mubr.msk.bf16.mxu1 %vm269_vm1, %v1353_v31 }
  0x3e   :  { %1274 = vmatmul.mubr.msk.bf16.gmra.mxu0 %vm269_vm1, %v1338_v28 }
  0x3f   :  { %1277 = vmatprep.mubr.msk.bf16.mxu0 %vm269_vm1, %v1339_v30 }
  0x40   :  { %1306 = vmatmul.mubr.msk.bf16.gmra.mxu1 %vm269_vm1, %v1354_v33 }
  0x41   :  { %1309 = vmatprep.mubr.msk.bf16.mxu1 %vm269_vm1, %v1355_v34 }
  0x46   :  { %1278 = vmatmul.mubr.msk.bf16.gmra.mxu0 %vm269_vm1, %v1340_v32 }
  0x48   :  { %1310 = vmatmul.mubr.msk.bf16.gmra.mxu1 %vm269_vm1, %v1356_v35 }
  0xce   :  { %v1251_v37 = vpop.f32.mrf.mxu0  ;;  %v1283_v49 = vpop.f32.mrf.mxu1 }
  0xcf   :  { %v413_v38 = vadd.f32 %v1251_v37, %v1545_v36  ;;  %v541_v54 = vadd.f32 %v1283_v49, %v1545_v36 }
  0xd0   :  { %v404_v39 = vpop.f32.mrf.mxu0  ;;  %v532_v55 = vpop.f32.mrf.mxu1 }
  0xd1   :  { %v661_v40 = vmax.f32 %v413_v38, 0.0  ;;  %v405_v41 = vadd.f32 %v1545_v36, %v404_v39  ;;  %v1572_v63 = vmax.f32 %v541_v54, 0.0  ;;  %v533_v4 = vadd.f32 %v1545_v36, %v532_v55 }
  0xd2   :  { %v1252_v42 = vpop.f32.mrf.mxu0  ;;  %v1574_v0 = vpop.f32.mrf.mxu1 }
  0xd3   :  { %726 = vst.msk [vmem:[%s2262_s3 + $0x10] sm:$0xff] %vm723_vm2, %v661_v40  ;;  %v659_v43 = vmax.f32 %v405_v41, 0.0  ;;  %v416_v44 = vadd.f32 %v1252_v42, %v1545_v36  ;;  %v923_v56 = vmul.f32 %v661_v40, %v661_v40  ;;  %v791_v1 = vsel %vm723_vm2, %v661_v40, 0.0  ;;  %758 = vst.msk [vmem:[%s2262_s3 + $0x110] sm:$0xff] %vm723_vm2, %v1572_v63 }
  0xd4   :  { %v407_v45 = vpop.f32.mrf.mxu0  ;;  %v1590_v10 = vpop.f32.mrf.mxu1  ;;  %v1602_v23 = vmax.f32 %v533_v4, 0.0 }
  0xd5   :  { %724 = vst.msk [vmem:[%s2262_s3] sm:$0xff] %vm723_vm2, %v659_v43  ;;  %v662_v46 = vmax.f32 %v416_v44, 0.0  ;;  %v408_v47 = vadd.f32 %v1545_v36, %v407_v45  ;;  %v921_v51 = vmul.f32 %v659_v43, %v659_v43  ;;  %v788_v59 = vsel %vm723_vm2, %v659_v43, 0.0 }
  0xd6   :  { %v1255_v48 = vpop.f32.mrf.mxu0  ;;  %v988_v11 = vsel %vm723_vm2, %v923_v56, 0.0  ;;  %v1599_v19 = vpop.f32.mrf.mxu1  ;;  %756 = vst.msk [vmem:[%s2262_s3 + $0x100] sm:$0xff] %vm723_vm2, %v1602_v23 }
  0xd7   :  { %727 = vst.msk [vmem:[%s2262_s3 + $0x18] sm:$0xff] %vm723_vm2, %v662_v46  ;;  %v429_v50 = vadd.f32 %v1255_v48, %v1545_v36  ;;  %v660_v52 = vmax.f32 %v408_v47, 0.0  ;;  %v985_v5 = vsel %vm723_vm2, %v921_v51, 0.0  ;;  %v924_v6 = vmul.f32 %v662_v46, %v662_v46 }
  0xd8   :  { %v420_v53 = vpop.f32.mrf.mxu0  ;;  %v793_v14 = vsel %vm723_vm2, %v662_v46, 0.0  ;;  %v1610_v29 = vpop.f32.mrf.mxu1 }
  0xd9   :  { %v665_v57 = vmax.f32 %v429_v50, 0.0  ;;  %v421_v58 = vadd.f32 %v1545_v36, %v420_v53  ;;  %725 = vst.msk [vmem:[%s2262_s3 + $0x8] sm:$0xff] %vm723_vm2, %v660_v52  ;;  %v789_v60 = vsel %vm723_vm2, %v660_v52, 0.0  ;;  %v922_v61 = vmul.f32 %v660_v52, %v660_v52 }
  0xda   :  { %v1256_v62 = vpop.f32.mrf.mxu0  ;;  %v790_v2 = vadd.f32 %v789_v60, %v788_v59  ;;  %v990_v24 = vsel %vm723_vm2, %v924_v6, 0.0  ;;  %v1624_v40 = vpop.f32.mrf.mxu1 }
  0xdb   :  { %730 = vst.msk [vmem:[%s2262_s3 + $0x30] sm:$0xff] %vm723_vm2, %v665_v57  ;;  %v663_v3 = vmax.f32 %v421_v58, 0.0  ;;  %v986_v7 = vsel %vm723_vm2, %v922_v61, 0.0  ;;  %v432_v8 = vadd.f32 %v1256_v62, %v1545_v36  ;;  %v927_v25 = vmul.f32 %v665_v57, %v665_v57 }
  0xdc   :  { %v423_v9 = vpop.f32.mrf.mxu0  ;;  %v792_v12 = vadd.f32 %v791_v1, %v790_v2  ;;  %v987_v13 = vadd.f32 %v986_v7, %v985_v5  ;;  %v799_v43 = vsel %vm723_vm2, %v665_v57, 0.0  ;;  %v1633_v48 = vpop.f32.mrf.mxu1  ;;  %v544_v5 = vadd.f32 %v1574_v0, %v1545_v36 }
  0xdd   :  { %728 = vst.msk [vmem:[%s2262_s3 + $0x20] sm:$0xff] %vm723_vm2, %v663_v3  ;;  %v925_v15 = vmul.f32 %v663_v3, %v663_v3  ;;  %v666_v16 = vmax.f32 %v432_v8, 0.0  ;;  %v424_v17 = vadd.f32 %v1545_v36, %v423_v9  ;;  %v795_v26 = vsel %vm723_vm2, %v663_v3, 0.0 }
  0xde   :  { %v1259_v18 = vpop.f32.mrf.mxu0  ;;  %v989_v20 = vadd.f32 %v988_v11, %v987_v13  ;;  %v794_v21 = vadd.f32 %v793_v14, %v792_v12  ;;  %v996_v49 = vsel %vm723_vm2, %v927_v25, 0.0 }
  0xdf   :  { %v445_v22 = vadd.f32 %v1259_v18, %v1545_v36  ;;  %731 = vst.msk [vmem:[%s2262_s3 + $0x38] sm:$0xff] %vm723_vm2, %v666_v16  ;;  %v664_v27 = vmax.f32 %v424_v17, 0.0  ;;  %v992_v34 = vsel %vm723_vm2, %v925_v15, 0.0  ;;  %v928_v35 = vmul.f32 %v666_v16, %v666_v16 }
  0xe0   :  { %v436_v28 = vpop.f32.mrf.mxu0  ;;  %v796_v30 = vadd.f32 %v795_v26, %v794_v21  ;;  %v991_v31 = vadd.f32 %v990_v24, %v989_v20  ;;  %v801_v53 = vsel %vm723_vm2, %v666_v16, 0.0  ;;  %v1643_v58 = vpop.f32.mrf.mxu1  ;;  %v1662_v16 = vmax.f32 %v544_v5, 0.0 }
  0xe1   :  { %v669_v32 = vmax.f32 %v445_v22, 0.0  ;;  %v437_v33 = vadd.f32 %v1545_v36, %v436_v28  ;;  %729 = vst.msk [vmem:[%s2262_s3 + $0x28] sm:$0xff] %vm723_vm2, %v664_v27  ;;  %v797_v37 = vsel %vm723_vm2, %v664_v27, 0.0  ;;  %v926_v38 = vmul.f32 %v664_v27, %v664_v27 }
  0xe2   :  { %v1260_v39 = vpop.f32.mrf.mxu0  ;;  %v993_v41 = vadd.f32 %v992_v34, %v991_v31  ;;  %v798_v42 = vadd.f32 %v797_v37, %v796_v30  ;;  %v998_v54 = vsel %vm723_vm2, %v928_v35, 0.0  ;;  %v1654_v6 = vpop.f32.mrf.mxu1  ;;  %759 = vst.msk [vmem:[%s2262_s3 + $0x118] sm:$0xff] %vm723_vm2, %v1662_v16 }
  0xe3   :  { %734 = vst.msk [vmem:[%s2262_s3 + $0x50] sm:$0xff] %vm723_vm2, %v669_v32  ;;  %v994_v44 = vsel %vm723_vm2, %v926_v38, 0.0  ;;  %v667_v45 = vmax.f32 %v437_v33, 0.0  ;;  %v448_v46 = vadd.f32 %v1260_v39, %v1545_v36  ;;  %v931_v1 = vmul.f32 %v669_v32, %v669_v32 }
  0xe4   :  { %v439_v47 = vpop.f32.mrf.mxu0  ;;  %v800_v50 = vadd.f32 %v799_v43, %v798_v42  ;;  %v995_v51 = vadd.f32 %v994_v44, %v993_v41  ;;  %v1664_v0 = vpop.f32.mrf.mxu1  ;;  %v807_v22 = vsel %vm723_vm2, %v669_v32, 0.0 }
  0xe5   :  { %v440_v52 = vadd.f32 %v1545_v36, %v439_v47  ;;  %732 = vst.msk [vmem:[%s2262_s3 + $0x40] sm:$0xff] %vm723_vm2, %v667_v45  ;;  %v929_v55 = vmul.f32 %v667_v45, %v667_v45  ;;  %v670_v56 = vmax.f32 %v448_v46, 0.0  ;;  %v803_v2 = vsel %vm723_vm2, %v667_v45, 0.0 }
  0xe6   :  { %v1263_v57 = vpop.f32.mrf.mxu0  ;;  %v997_v59 = vadd.f32 %v996_v49, %v995_v51  ;;  %v802_v60 = vadd.f32 %v801_v53, %v800_v50  ;;  %v1678_v26 = vpop.f32.mrf.mxu1  ;;  %v1004_v32 = vsel %vm723_vm2, %v931_v1, 0.0 }
  0xe7   :  { %v668_v61 = vmax.f32 %v440_v52, 0.0  ;;  %v461_v62 = vadd.f32 %v1263_v57, %v1545_v36  ;;  %v1000_v3 = vsel %vm723_vm2, %v929_v55, 0.0  ;;  %735 = vst.msk [vmem:[%s2262_s3 + $0x58] sm:$0xff] %vm723_vm2, %v670_v56  ;;  %v932_v12 = vmul.f32 %v670_v56, %v670_v56 }
  0xe8   :  { %v452_v4 = vpop.f32.mrf.mxu0  ;;  %v804_v7 = vadd.f32 %v803_v2, %v802_v60  ;;  %v999_v8 = vadd.f32 %v998_v54, %v997_v59  ;;  %v809_v33 = vsel %vm723_vm2, %v670_v56, 0.0  ;;  %v1687_v37 = vpop.f32.mrf.mxu1  ;;  %v536_v57 = vadd.f32 %v1545_v36, %v1590_v10 }
  0xe9   :  { %733 = vst.msk [vmem:[%s2262_s3 + $0x48] sm:$0xff] %vm723_vm2, %v668_v61  ;;  %v805_v9 = vsel %vm723_vm2, %v668_v61, 0.0  ;;  %v930_v11 = vmul.f32 %v668_v61, %v668_v61  ;;  %v673_v13 = vmax.f32 %v461_v62, 0.0  ;;  %v453_v14 = vadd.f32 %v1545_v36, %v452_v4 }
  0xea   :  { %v1264_v15 = vpop.f32.mrf.mxu0  ;;  %v1001_v17 = vadd.f32 %v1000_v3, %v999_v8  ;;  %v806_v18 = vadd.f32 %v805_v9, %v804_v7  ;;  %v1006_v38 = vsel %vm723_vm2, %v932_v12, 0.0  ;;  %v1696_v47 = vpop.f32.mrf.mxu1  ;;  %v1716_v7 = vmax.f32 %v536_v57, 0.0 }
  0xeb   :  { %v1002_v20 = vsel %vm723_vm2, %v930_v11, 0.0  ;;  %v464_v21 = vadd.f32 %v1264_v15, %v1545_v36  ;;  %738 = vst.msk [vmem:[%s2262_s3 + $0x70] sm:$0xff] %vm723_vm2, %v673_v13  ;;  %v671_v24 = vmax.f32 %v453_v14, 0.0  ;;  %v935_v42 = vmul.f32 %v673_v13, %v673_v13 }
  0xec   :  { %v455_v25 = vpop.f32.mrf.mxu0  ;;  %v808_v27 = vadd.f32 %v807_v22, %v806_v18  ;;  %v1003_v28 = vadd.f32 %v1002_v20, %v1001_v17  ;;  %v1707_v59 = vpop.f32.mrf.mxu1  ;;  %v815_v2 = vsel %vm723_vm2, %v673_v13, 0.0  ;;  %757 = vst.msk [vmem:[%s2262_s3 + $0x108] sm:$0xff] %vm723_vm2, %v1716_v7 }
  0xed   :  { %v674_v30 = vmax.f32 %v464_v21, 0.0  ;;  %v456_v31 = vadd.f32 %v1545_v36, %v455_v25  ;;  %736 = vst.msk [vmem:[%s2262_s3 + $0x60] sm:$0xff] %vm723_vm2, %v671_v24  ;;  %v933_v34 = vmul.f32 %v671_v24, %v671_v24  ;;  %v811_v43 = vsel %vm723_vm2, %v671_v24, 0.0 }
  0xee   :  { %v1267_v35 = vpop.f32.mrf.mxu0  ;;  %v1005_v39 = vadd.f32 %v1004_v32, %v1003_v28  ;;  %v810_v41 = vadd.f32 %v809_v33, %v808_v27  ;;  %v1012_v10 = vsel %vm723_vm2, %v935_v42, 0.0  ;;  %v1730_v17 = vpop.f32.mrf.mxu1 }
  0xef   :  { %739 = vst.msk [vmem:[%s2262_s3 + $0x78] sm:$0xff] %vm723_vm2, %v674_v30  ;;  %v672_v44 = vmax.f32 %v456_v31, 0.0  ;;  %v477_v45 = vadd.f32 %v1267_v35, %v1545_v36  ;;  %v1008_v51 = vsel %vm723_vm2, %v933_v34, 0.0  ;;  %v936_v3 = vmul.f32 %v674_v30, %v674_v30 }
  0xf0   :  { %v468_v46 = vpop.f32.mrf.mxu0  ;;  %v812_v49 = vadd.f32 %v811_v43, %v810_v41  ;;  %v1007_v50 = vadd.f32 %v1006_v38, %v1005_v39  ;;  %v817_v11 = vsel %vm723_vm2, %v674_v30, 0.0  ;;  %v1746_v41 = vpop.f32.mrf.mxu1 }
  0xf1   :  { %v469_v52 = vadd.f32 %v1545_v36, %v468_v46  ;;  %737 = vst.msk [vmem:[%s2262_s3 + $0x68] sm:$0xff] %vm723_vm2, %v672_v44  ;;  %v813_v53 = vsel %vm723_vm2, %v672_v44, 0.0  ;;  %v934_v54 = vmul.f32 %v672_v44, %v672_v44  ;;  %v677_v55 = vmax.f32 %v477_v45, 0.0 }
  0xf2   :  { %v1268_v56 = vpop.f32.mrf.mxu0  ;;  %v1009_v60 = vadd.f32 %v1008_v51, %v1007_v50  ;;  %v814_v61 = vadd.f32 %v813_v53, %v812_v49  ;;  %v1014_v22 = vsel %vm723_vm2, %v936_v3, 0.0 }
  0xf3   :  { %v675_v62 = vmax.f32 %v469_v52, 0.0  ;;  %v480_v1 = vadd.f32 %v1268_v56, %v1545_v36  ;;  %v1010_v4 = vsel %vm723_vm2, %v934_v54, 0.0  ;;  %742 = vst.msk [vmem:[%s2262_s3 + $0x90] sm:$0xff] %vm723_vm2, %v677_v55  ;;  %v939_v24 = vmul.f32 %v677_v55, %v677_v55 }
  0xf4   :  { %v471_v5 = vpop.f32.mrf.mxu0  ;;  %v816_v8 = vadd.f32 %v815_v2, %v814_v61  ;;  %v1011_v9 = vadd.f32 %v1010_v4, %v1009_v60  ;;  %v823_v42 = vsel %vm723_vm2, %v677_v55, 0.0  ;;  %v557_v52 = vadd.f32 %v1599_v19, %v1545_v36  ;;  %v1766_v2 = vpop.f32.mrf.mxu1 }
  0xf5   :  { %740 = vst.msk [vmem:[%s2262_s3 + $0x80] sm:$0xff] %vm723_vm2, %v675_v62  ;;  %v937_v12 = vmul.f32 %v675_v62, %v675_v62  ;;  %v678_v13 = vmax.f32 %v480_v1, 0.0  ;;  %v472_v14 = vadd.f32 %v1545_v36, %v471_v5  ;;  %v819_v25 = vsel %vm723_vm2, %v675_v62, 0.0 }
  0xf6   :  { %v1271_v15 = vpop.f32.mrf.mxu0  ;;  %v1013_v18 = vadd.f32 %v1012_v10, %v1011_v9  ;;  %v818_v20 = vadd.f32 %v817_v11, %v816_v8  ;;  %v1020_v53 = vsel %vm723_vm2, %v939_v24, 0.0  ;;  %v1764_v1 = vmax.f32 %v557_v52, 0.0 }
  0xf7   :  { %v493_v21 = vadd.f32 %v1271_v15, %v1545_v36  ;;  %743 = vst.msk [vmem:[%s2262_s3 + $0x98] sm:$0xff] %vm723_vm2, %v678_v13  ;;  %v676_v27 = vmax.f32 %v472_v14, 0.0  ;;  %v1016_v34 = vsel %vm723_vm2, %v937_v12, 0.0  ;;  %v940_v44 = vmul.f32 %v678_v13, %v678_v13 }
  0xf8   :  { %v484_v28 = vpop.f32.mrf.mxu0  ;;  %v820_v30 = vadd.f32 %v819_v25, %v818_v20  ;;  %v1015_v31 = vadd.f32 %v1014_v22, %v1013_v18  ;;  %v825_v57 = vsel %vm723_vm2, %v678_v13, 0.0  ;;  %762 = vst.msk [vmem:[%s2262_s3 + $0x130] sm:$0xff] %vm723_vm2, %v1764_v1  ;;  %v1787_v25 = vpop.f32.mrf.mxu1 }
  0xf9   :  { %v681_v32 = vmax.f32 %v493_v21, 0.0  ;;  %v485_v33 = vadd.f32 %v1545_v36, %v484_v28  ;;  %741 = vst.msk [vmem:[%s2262_s3 + $0x88] sm:$0xff] %vm723_vm2, %v676_v27  ;;  %v821_v35 = vsel %vm723_vm2, %v676_v27, 0.0  ;;  %v938_v38 = vmul.f32 %v676_v27, %v676_v27 }
  0xfa   :  { %v1272_v39 = vpop.f32.mrf.mxu0  ;;  %v1017_v43 = vadd.f32 %v1016_v34, %v1015_v31  ;;  %v822_v45 = vadd.f32 %v821_v35, %v820_v30  ;;  %v1022_v10 = vsel %vm723_vm2, %v940_v44, 0.0 }
  0xfb   :  { %746 = vst.msk [vmem:[%s2262_s3 + $0xb0] sm:$0xff] %vm723_vm2, %v681_v32  ;;  %v1018_v46 = vsel %vm723_vm2, %v938_v38, 0.0  ;;  %v679_v49 = vmax.f32 %v485_v33, 0.0  ;;  %v496_v50 = vadd.f32 %v1272_v39, %v1545_v36  ;;  %v943_v8 = vmul.f32 %v681_v32, %v681_v32 }
  0xfc   :  { %v487_v51 = vpop.f32.mrf.mxu0  ;;  %v824_v54 = vadd.f32 %v823_v42, %v822_v45  ;;  %v1019_v55 = vadd.f32 %v1018_v46, %v1017_v43  ;;  %v831_v33 = vsel %vm723_vm2, %v681_v32, 0.0 }
  0xfd   :  { %v488_v56 = vadd.f32 %v1545_v36, %v487_v51  ;;  %744 = vst.msk [vmem:[%s2262_s3 + $0xa0] sm:$0xff] %vm723_vm2, %v679_v49  ;;  %v941_v60 = vmul.f32 %v679_v49, %v679_v49  ;;  %v682_v61 = vmax.f32 %v496_v50, 0.0  ;;  %v827_v9 = vsel %vm723_vm2, %v679_v49, 0.0  ;;  %v1805_v50 = vpop.f32.mrf.mxu1 }
  0xfe   :  { %v1275_v62 = vpop.f32.mrf.mxu0  ;;  %v1021_v19 = vadd.f32 %v1020_v53, %v1019_v55  ;;  %v826_v3 = vadd.f32 %v825_v57, %v824_v54  ;;  %v1028_v44 = vsel %vm723_vm2, %v943_v8, 0.0  ;;  %v549_v49 = vadd.f32 %v1545_v36, %v1610_v29 }
  0xff   :  { %v680_v4 = vmax.f32 %v488_v56, 0.0  ;;  %v509_v5 = vadd.f32 %v1275_v62, %v1545_v36  ;;  %747 = vst.msk [vmem:[%s2262_s3 + $0xb8] sm:$0xff] %vm723_vm2, %v682_v61  ;;  %v1024_v18 = vsel %vm723_vm2, %v941_v60, 0.0  ;;  %v944_v20 = vmul.f32 %v682_v61, %v682_v61 }
 0x100   :  { %v500_v11 = vpop.f32.mrf.mxu0  ;;  %v828_v12 = vadd.f32 %v827_v9, %v826_v3  ;;  %v1023_v13 = vadd.f32 %v1022_v10, %v1021_v19  ;;  %v833_v45 = vsel %vm723_vm2, %v682_v61, 0.0  ;;  %v1814_v61 = vmax.f32 %v549_v49, 0.0 }
 0x101   :  { %745 = vst.msk [vmem:[%s2262_s3 + $0xa8] sm:$0xff] %vm723_vm2, %v680_v4  ;;  %v829_v14 = vsel %vm723_vm2, %v680_v4, 0.0  ;;  %v942_v15 = vmul.f32 %v680_v4, %v680_v4  ;;  %v685_v21 = vmax.f32 %v509_v5, 0.0  ;;  %v501_v22 = vadd.f32 %v1545_v36, %v500_v11  ;;  %v1828_v11 = vpop.f32.mrf.mxu1 }
 0x102   :  { %v1276_v24 = vpop.f32.mrf.mxu0  ;;  %v1025_v27 = vadd.f32 %v1024_v18, %v1023_v13  ;;  %v830_v28 = vadd.f32 %v829_v14, %v828_v12  ;;  %v1030_v51 = vsel %vm723_vm2, %v944_v20, 0.0  ;;  %760 = vst.msk [vmem:[%s2262_s3 + $0x120] sm:$0xff] %vm723_vm2, %v1814_v61 }
 0x103   :  { %v1026_v30 = vsel %vm723_vm2, %v942_v15, 0.0  ;;  %v512_v31 = vadd.f32 %v1276_v24, %v1545_v36  ;;  %750 = vst.msk [vmem:[%s2262_s3 + $0xd0] sm:$0xff] %vm723_vm2, %v685_v21  ;;  %v683_v34 = vmax.f32 %v501_v22, 0.0  ;;  %v947_v53 = vmul.f32 %v685_v21, %v685_v21 }
 0x104   :  { %v503_v35 = vpop.f32.mrf.mxu0  ;;  %v832_v38 = vadd.f32 %v831_v33, %v830_v28  ;;  %v1027_v39 = vadd.f32 %v1026_v30, %v1025_v27  ;;  %v839_v18 = vsel %vm723_vm2, %v685_v21, 0.0 }
 0x105   :  { %v686_v42 = vmax.f32 %v512_v31, 0.0  ;;  %v504_v43 = vadd.f32 %v1545_v36, %v503_v35  ;;  %748 = vst.msk [vmem:[%s2262_s3 + $0xc0] sm:$0xff] %vm723_vm2, %v683_v34  ;;  %v945_v32 = vmul.f32 %v683_v34, %v683_v34  ;;  %v835_v55 = vsel %vm723_vm2, %v683_v34, 0.0  ;;  %v1844_v34 = vpop.f32.mrf.mxu1 }
 0x106   :  { %v1279_v46 = vpop.f32.mrf.mxu0  ;;  %v1029_v52 = vadd.f32 %v1028_v44, %v1027_v39  ;;  %v834_v54 = vadd.f32 %v833_v45, %v832_v38  ;;  %v1036_v24 = vsel %vm723_vm2, %v947_v53, 0.0 }
 0x107   :  { %751 = vst.msk [vmem:[%s2262_s3 + $0xd8] sm:$0xff] %vm723_vm2, %v686_v42  ;;  %v684_v56 = vmax.f32 %v504_v43, 0.0  ;;  %v525_v57 = vadd.f32 %v1279_v46, %v1545_v36  ;;  %v948_v19 = vmul.f32 %v686_v42, %v686_v42  ;;  %v1032_v4 = vsel %vm723_vm2, %v945_v32, 0.0 }
 0x108   :  { %v516_v60 = vpop.f32.mrf.mxu0  ;;  %v836_v29 = vadd.f32 %v835_v55, %v834_v54  ;;  %v1031_v62 = vadd.f32 %v1030_v51, %v1029_v52  ;;  %v841_v30 = vsel %vm723_vm2, %v686_v42, 0.0  ;;  %v560_v43 = vadd.f32 %v1624_v40, %v1545_v36 }
 0x109   :  { %v517_v3 = vadd.f32 %v1545_v36, %v516_v60  ;;  %749 = vst.msk [vmem:[%s2262_s3 + $0xc8] sm:$0xff] %vm723_vm2, %v684_v56  ;;  %v837_v5 = vsel %vm723_vm2, %v684_v56, 0.0  ;;  %v946_v10 = vmul.f32 %v684_v56, %v684_v56  ;;  %v689_v8 = vmax.f32 %v525_v57, 0.0 }
 0x10a   :  { %v1280_v9 = vpop.f32.mrf.mxu0  ;;  %v1033_v12 = vadd.f32 %v1032_v4, %v1031_v62  ;;  %v838_v13 = vadd.f32 %v837_v5, %v836_v29  ;;  %v1038_v35 = vsel %vm723_vm2, %v948_v19, 0.0  ;;  %v552_v32 = vadd.f32 %v1545_v36, %v1633_v48  ;;  %v1868_v48 = vpop.f32.mrf.mxu1 }
 0x10b   :  { %v687_v14 = vmax.f32 %v517_v3, 0.0  ;;  %v528_v15 = vadd.f32 %v1280_v9, %v1545_v36  ;;  %v1034_v20 = vsel %vm723_vm2, %v946_v10, 0.0  ;;  %754 = vst.msk [vmem:[%s2262_s3 + $0xf0] sm:$0xff] %vm723_vm2, %v689_v8  ;;  %v951_v44 = vmul.f32 %v689_v8, %v689_v8 }
 0x10c   :  { %v519_v22 = vpop.f32.mrf.mxu0  ;;  %v840_v27 = vadd.f32 %v839_v18, %v838_v13  ;;  %v1035_v28 = vadd.f32 %v1034_v20, %v1033_v12  ;;  %v1856_v51 = vmax.f32 %v560_v43, 0.0  ;;  %v573_v52 = vadd.f32 %v1643_v58, %v1545_v36  ;;  %v1901_v13 = vpop.f32.mrf.mxu1 }
 0x10d   :  { %752 = vst.msk [vmem:[%s2262_s3 + $0xe0] sm:$0xff] %vm723_vm2, %v687_v14  ;;  %v949_v21 = vmul.f32 %v687_v14, %v687_v14  ;;  %v690_v31 = vmax.f32 %v528_v15, 0.0  ;;  %v520_v33 = vadd.f32 %v1545_v36, %v519_v22  ;;  %v843_v45 = vsel %vm723_vm2, %v687_v14, 0.0 }
 0x10e   :  { %v1037_v38 = vadd.f32 %v1036_v24, %v1035_v28  ;;  %v842_v39 = vadd.f32 %v841_v30, %v840_v27  ;;  %v1866_v55 = vmax.f32 %v552_v32, 0.0  ;;  %v851_v57 = vsel %vm723_vm2, %v1602_v23, 0.0  ;;  %763 = vst.msk [vmem:[%s2262_s3 + $0x138] sm:$0xff] %vm723_vm2, %v1856_v51 }
 0x10f   :  { %755 = vst.msk [vmem:[%s2262_s3 + $0xf8] sm:$0xff] %vm723_vm2, %v690_v31  ;;  %v688_v42 = vmax.f32 %v520_v33, 0.0  ;;  %v1040_v40 = vsel %vm723_vm2, %v949_v21, 0.0  ;;  %v847_v58 = vsel %vm723_vm2, %v689_v8, 0.0  ;;  %v952_v29 = vmul.f32 %v690_v31, %v690_v31  ;;  %v1935_v33 = vpop.f32.mrf.mxu1 }
 0x110   :  { %v844_v46 = vadd.f32 %v843_v45, %v842_v39  ;;  %v1039_v49 = vadd.f32 %v1038_v35, %v1037_v38  ;;  %761 = vst.msk [vmem:[%s2262_s3 + $0x128] sm:$0xff] %vm723_vm2, %v1866_v55  ;;  %v1884_v19 = vmax.f32 %v573_v52, 0.0  ;;  %v953_v3 = vmul.f32 %v1602_v23, %v1602_v23 }
 0x111   :  { %753 = vst.msk [vmem:[%s2262_s3 + $0xe8] sm:$0xff] %vm723_vm2, %v688_v42  ;;  %v845_v53 = vsel %vm723_vm2, %v688_v42, 0.0  ;;  %v950_v54 = vmul.f32 %v688_v42, %v688_v42  ;;  %v565_v10 = vadd.f32 %v1545_v36, %v1654_v6  ;;  %v1044_v8 = vsel %vm723_vm2, %v951_v44, 0.0 }
 0x112   :  { %v1041_v56 = vadd.f32 %v1040_v40, %v1039_v49  ;;  %v846_v60 = vadd.f32 %v845_v53, %v844_v46  ;;  %v849_v9 = vsel %vm723_vm2, %v690_v31, 0.0  ;;  %v954_v12 = vmul.f32 %v1716_v7, %v1716_v7  ;;  %766 = vst.msk [vmem:[%s2262_s3 + $0x150] sm:$0xff] %vm723_vm2, %v1884_v19 }
 0x113   :  { %v1042_v62 = vsel %vm723_vm2, %v950_v54, 0.0  ;;  %v576_v23 = vadd.f32 %v1664_v0, %v1545_v36  ;;  %v1903_v15 = vmax.f32 %v565_v10, 0.0  ;;  %v568_v18 = vadd.f32 %v1545_v36, %v1678_v26 }
 0x114   :  { %v848_v4 = vadd.f32 %v847_v58, %v846_v60  ;;  %v1043_v5 = vadd.f32 %v1042_v62, %v1041_v56  ;;  %v1046_v20 = vsel %vm723_vm2, %v952_v29, 0.0  ;;  %v589_v24 = vadd.f32 %v1687_v37, %v1545_v36 }
 0x115   :  { %v1908_v22 = vmax.f32 %v576_v23, 0.0  ;;  %v581_v27 = vadd.f32 %v1545_v36, %v1696_v47  ;;  %v955_v0 = vmul.f32 %v1572_v63, %v1572_v63  ;;  %v1048_v28 = vsel %vm723_vm2, %v953_v3, 0.0  ;;  %764 = vst.msk [vmem:[%s2262_s3 + $0x140] sm:$0xff] %vm723_vm2, %v1903_v15 }
 0x116   :  { %v1045_v14 = vadd.f32 %v1044_v8, %v1043_v5  ;;  %v850_v6 = vadd.f32 %v849_v9, %v848_v4  ;;  %v956_v26 = vmul.f32 %v1662_v16, %v1662_v16  ;;  %v853_v37 = vsel %vm723_vm2, %v1716_v7, 0.0 }
 0x117   :  { %767 = vst.msk [vmem:[%s2262_s3 + $0x158] sm:$0xff] %vm723_vm2, %v1908_v22  ;;  %v1931_v47 = vmax.f32 %v568_v18, 0.0  ;;  %v1933_v31 = vmax.f32 %v589_v24, 0.0  ;;  %v1937_v39 = vmax.f32 %v581_v27, 0.0  ;;  %v855_v43 = vsel %vm723_vm2, %v1572_v63, 0.0 }
 0x118   :  { %v852_v30 = vadd.f32 %v851_v57, %v850_v6  ;;  %v1047_v21 = vadd.f32 %v1046_v20, %v1045_v14  ;;  %v1050_v7 = vsel %vm723_vm2, %v954_v12, 0.0  ;;  %v1052_v44 = vsel %vm723_vm2, %v955_v0, 0.0 }
 0x119   :  { %765 = vst.msk [vmem:[%s2262_s3 + $0x148] sm:$0xff] %vm723_vm2, %v1931_v47  ;;  %770 = vst.msk [vmem:[%s2262_s3 + $0x170] sm:$0xff] %vm723_vm2, %v1933_v31  ;;  %v857_v45 = vsel %vm723_vm2, %v1662_v16, 0.0  ;;  %v1054_v32 = vsel %vm723_vm2, %v956_v26, 0.0  ;;  %v957_v46 = vmul.f32 %v1814_v61, %v1814_v61  ;;  %v592_v49 = vadd.f32 %v1707_v59, %v1545_v36  ;;  %v1967_v16 = vpop.f32.mrf.mxu1 }
 0x11a   :  { %v854_v35 = vadd.f32 %v853_v37, %v852_v30  ;;  %v1049_v38 = vadd.f32 %v1048_v28, %v1047_v21  ;;  %768 = vst.msk [vmem:[%s2262_s3 + $0x160] sm:$0xff] %vm723_vm2, %v1937_v39  ;;  %v584_v52 = vadd.f32 %v1545_v36, %v1730_v17  ;;  %v859_v54 = vsel %vm723_vm2, %v1814_v61, 0.0 }
 0x11b   :  { %v605_v56 = vadd.f32 %v1746_v41, %v1545_v36  ;;  %v958_v57 = vmul.f32 %v1866_v55, %v1866_v55  ;;  %v1975_v60 = vmax.f32 %v592_v49, 0.0  ;;  %v597_v59 = vadd.f32 %v1545_v36, %v1766_v2  ;;  %v2002_v2 = vpop.f32.mrf.mxu1 }
 0x11c   :  { %v856_v63 = vadd.f32 %v855_v43, %v854_v35  ;;  %v1051_v42 = vadd.f32 %v1050_v7, %v1049_v38  ;;  %v1977_v58 = vmax.f32 %v584_v52, 0.0  ;;  %v608_v61 = vadd.f32 %v1787_v25, %v1545_v36 }
 0x11d   :  { %v1981_v62 = vmax.f32 %v605_v56, 0.0  ;;  %v959_v41 = vmul.f32 %v1764_v1, %v1764_v1  ;;  %v1056_v3 = vsel %vm723_vm2, %v957_v46, 0.0  ;;  %v960_v4 = vmul.f32 %v1856_v51, %v1856_v51  ;;  %771 = vst.msk [vmem:[%s2262_s3 + $0x178] sm:$0xff] %vm723_vm2, %v1975_v60 }
 0x11e   :  { %v1053_v40 = vadd.f32 %v1052_v44, %v1051_v42  ;;  %v858_v53 = vadd.f32 %v857_v45, %v856_v63  ;;  %v861_v5 = vsel %vm723_vm2, %v1866_v55, 0.0  ;;  %769 = vst.msk [vmem:[%s2262_s3 + $0x168] sm:$0xff] %vm723_vm2, %v1977_v58  ;;  %v863_v55 = vsel %vm723_vm2, %v1764_v1, 0.0 }
 0x11f   :  { %774 = vst.msk [vmem:[%s2262_s3 + $0x190] sm:$0xff] %vm723_vm2, %v1981_v62  ;;  %v1058_v8 = vsel %vm723_vm2, %v958_v57, 0.0  ;;  %v2012_v9 = vmax.f32 %v597_v59, 0.0  ;;  %v2014_v12 = vmax.f32 %v608_v61, 0.0  ;;  %v961_v6 = vmul.f32 %v1903_v15, %v1903_v15 }
 0x120   :  { %v860_v17 = vadd.f32 %v859_v54, %v858_v53  ;;  %v1055_v29 = vadd.f32 %v1054_v32, %v1053_v40  ;;  %v600_v18 = vadd.f32 %v1545_v36, %v1805_v50  ;;  %v1060_v20 = vsel %vm723_vm2, %v959_v41, 0.0  ;;  %v631_v50 = vpop.f32.mrf.mxu1 }
 0x121   :  { %v865_v24 = vsel %vm723_vm2, %v1856_v51, 0.0  ;;  %v1062_v1 = vsel %vm723_vm2, %v960_v4, 0.0  ;;  %v963_v27 = vmul.f32 %v1884_v19, %v1884_v19  ;;  %772 = vst.msk [vmem:[%s2262_s3 + $0x180] sm:$0xff] %vm723_vm2, %v2012_v9  ;;  %775 = vst.msk [vmem:[%s2262_s3 + $0x198] sm:$0xff] %vm723_vm2, %v2014_v12  ;;  %v621_v30 = vadd.f32 %v1828_v11, %v1545_v36 }
 0x122   :  { %v1057_v25 = vadd.f32 %v1056_v3, %v1055_v29  ;;  %v862_v10 = vadd.f32 %v861_v5, %v860_v17  ;;  %v2036_v28 = vmax.f32 %v600_v18, 0.0  ;;  %v867_v21 = vsel %vm723_vm2, %v1903_v15, 0.0  ;;  %v1311_v45 = vpop.f32.mrf.mxu1 }
 0x123   :  { %v962_v26 = vmul.f32 %v1931_v47, %v1931_v47  ;;  %v613_v37 = vadd.f32 %v1545_v36, %v1844_v34  ;;  %v624_v35 = vadd.f32 %v1868_v48, %v1545_v36  ;;  %v1064_v7 = vsel %vm723_vm2, %v961_v6, 0.0 }
 0x124   :  { %v864_v23 = vadd.f32 %v863_v55, %v862_v10  ;;  %v1059_v14 = vadd.f32 %v1058_v8, %v1057_v25  ;;  %v869_v44 = vsel %vm723_vm2, %v1931_v47, 0.0  ;;  %773 = vst.msk [vmem:[%s2262_s3 + $0x188] sm:$0xff] %vm723_vm2, %v2036_v28  ;;  %v2056_v11 = vmax.f32 %v621_v30, 0.0  ;;  %v644_v56 = vpop.f32.mrf.mxu1 }
 0x125   :  { %v2058_v15 = vmax.f32 %v613_v37, 0.0  ;;  %v2060_v34 = vmax.f32 %v624_v35, 0.0  ;;  %v616_v48 = vadd.f32 %v1545_v36, %v1901_v13  ;;  %v637_v47 = vadd.f32 %v1935_v33, %v1545_v36 }
 0x126   :  { %v1061_v0 = vadd.f32 %v1060_v20, %v1059_v14  ;;  %v866_v51 = vadd.f32 %v865_v24, %v864_v23  ;;  %v871_v32 = vsel %vm723_vm2, %v1884_v19, 0.0  ;;  %v964_v46 = vmul.f32 %v1908_v22, %v1908_v22  ;;  %778 = vst.msk [vmem:[%s2262_s3 + $0x1b0] sm:$0xff] %vm723_vm2, %v2056_v11  ;;  %v1312_v8 = vpop.f32.mrf.mxu1 }
 0x127   :  { %v1066_v49 = vsel %vm723_vm2, %v962_v26, 0.0  ;;  %776 = vst.msk [vmem:[%s2262_s3 + $0x1a0] sm:$0xff] %vm723_vm2, %v2058_v15  ;;  %779 = vst.msk [vmem:[%s2262_s3 + $0x1b8] sm:$0xff] %vm723_vm2, %v2060_v34  ;;  %v1068_v19 = vsel %vm723_vm2, %v963_v27, 0.0  ;;  %v873_v52 = vsel %vm723_vm2, %v1908_v22, 0.0  ;;  %v965_v40 = vmul.f32 %v1937_v39, %v1937_v39 }
 0x128   :  { %v868_v38 = vadd.f32 %v867_v21, %v866_v51  ;;  %v1063_v43 = vadd.f32 %v1062_v1, %v1061_v0  ;;  %v2091_v53 = vmax.f32 %v616_v48, 0.0  ;;  %v2093_v54 = vmax.f32 %v637_v47, 0.0 }
 0x129   :  { %v966_v17 = vmul.f32 %v1977_v58, %v1977_v58  ;;  %v629_v29 = vadd.f32 %v1545_v36, %v1967_v16  ;;  %v1070_v61 = vsel %vm723_vm2, %v964_v46, 0.0  ;;  %v879_v22 = vsel %vm723_vm2, %v1933_v31, 0.0 }
 0x12a   :  { %v1065_v63 = vadd.f32 %v1064_v7, %v1063_v43  ;;  %v870_v42 = vadd.f32 %v869_v44, %v868_v38  ;;  %v967_v41 = vmul.f32 %v1933_v31, %v1933_v31  ;;  %v875_v3 = vsel %vm723_vm2, %v1937_v39, 0.0  ;;  %777 = vst.msk [vmem:[%s2262_s3 + $0x1a8] sm:$0xff] %vm723_vm2, %v2091_v53  ;;  %782 = vst.msk [vmem:[%s2262_s3 + $0x1d0] sm:$0xff] %vm723_vm2, %v2093_v54 }
 0x12b   :  { %v2116_v5 = vmax.f32 %v629_v29, 0.0  ;;  %v640_v31 = vadd.f32 %v2002_v2, %v1545_v36  ;;  %v1072_v39 = vsel %vm723_vm2, %v965_v40, 0.0  ;;  %v877_v25 = vsel %vm723_vm2, %v1977_v58, 0.0 }
 0x12c   :  { %v872_v13 = vadd.f32 %v871_v32, %v870_v42  ;;  %v1067_v33 = vadd.f32 %v1066_v49, %v1065_v63  ;;  %v632_v10 = vadd.f32 %v1545_v36, %v631_v50  ;;  %v653_v55 = vadd.f32 %v1311_v45, %v1545_v36 }
 0x12d   :  { %v968_v14 = vmul.f32 %v1975_v60, %v1975_v60  ;;  %v1074_v18 = vsel %vm723_vm2, %v966_v17, 0.0  ;;  %780 = vst.msk [vmem:[%s2262_s3 + $0x1c0] sm:$0xff] %vm723_vm2, %v2116_v5  ;;  %v2133_v2 = vmax.f32 %v640_v31, 0.0  ;;  %v645_v24 = vadd.f32 %v1545_v36, %v644_v56 }
 0x12e   :  { %v1069_v57 = vadd.f32 %v1068_v19, %v1067_v33  ;;  %v874_v59 = vadd.f32 %v873_v52, %v872_v13  ;;  %v2135_v58 = vmax.f32 %v632_v10, 0.0  ;;  %v2137_v20 = vmax.f32 %v653_v55, 0.0 }
 0x12f   :  { %v656_v50 = vadd.f32 %v1312_v8, %v1545_v36  ;;  %v1076_v0 = vsel %vm723_vm2, %v967_v41, 0.0  ;;  %v881_v51 = vsel %vm723_vm2, %v1975_v60, 0.0  ;;  %v969_v30 = vmul.f32 %v2012_v9, %v2012_v9  ;;  %783 = vst.msk [vmem:[%s2262_s3 + $0x1d8] sm:$0xff] %vm723_vm2, %v2133_v2  ;;  %v647_v60 = vpop.f32.mrf.mxu1 }
 0x130   :  { %v876_v16 = vadd.f32 %v875_v3, %v874_v59  ;;  %v1071_v4 = vadd.f32 %v1070_v61, %v1069_v57  ;;  %781 = vst.msk [vmem:[%s2262_s3 + $0x1c8] sm:$0xff] %vm723_vm2, %v2135_v58  ;;  %786 = vst.msk [vmem:[%s2262_s3 + $0x1f0] sm:$0xff] %vm723_vm2, %v2137_v20  ;;  %v1078_v21 = vsel %vm723_vm2, %v968_v14, 0.0  ;;  %v883_v35 = vsel %vm723_vm2, %v2012_v9, 0.0 }
 0x131   :  { %v970_v38 = vmul.f32 %v2036_v28, %v2036_v28  ;;  %v2166_v43 = vmax.f32 %v645_v24, 0.0  ;;  %v2168_v7 = vmax.f32 %v656_v50, 0.0  ;;  %v648_v45 = vadd.f32 %v1545_v36, %v647_v60 }
 0x132   :  { %v1073_v23 = vadd.f32 %v1072_v39, %v1071_v4  ;;  %v878_v6 = vadd.f32 %v877_v25, %v876_v16  ;;  %v971_v63 = vmul.f32 %v1981_v62, %v1981_v62  ;;  %v1080_v42 = vsel %vm723_vm2, %v969_v30, 0.0 }
 0x133   :  { %v885_v47 = vsel %vm723_vm2, %v2036_v28, 0.0  ;;  %784 = vst.msk [vmem:[%s2262_s3 + $0x1e0] sm:$0xff] %vm723_vm2, %v2166_v43  ;;  %787 = vst.msk [vmem:[%s2262_s3 + $0x1f8] sm:$0xff] %vm723_vm2, %v2168_v7  ;;  %v720_v32 = vmax.f32 %v648_v45, 0.0  ;;  %v887_v46 = vsel %vm723_vm2, %v1981_v62, 0.0  ;;  %v972_v28 = vmul.f32 %v2014_v12, %v2014_v12 }
 0x134   :  { %v880_v1 = vadd.f32 %v879_v22, %v878_v6  ;;  %v1075_v27 = vadd.f32 %v1074_v18, %v1073_v23  ;;  %v1082_v49 = vsel %vm723_vm2, %v970_v38, 0.0  ;;  %v1084_v33 = vsel %vm723_vm2, %v971_v63, 0.0 }
 0x135   :  { %785 = vst.msk [vmem:[%s2262_s3 + $0x1e8] sm:$0xff] %vm723_vm2, %v720_v32  ;;  %v889_v52 = vsel %vm723_vm2, %v2014_v12, 0.0  ;;  %v973_v62 = vmul.f32 %v2058_v15, %v2058_v15  ;;  %v1086_v57 = vsel %vm723_vm2, %v972_v28, 0.0  ;;  %v891_v59 = vsel %vm723_vm2, %v2058_v15, 0.0  ;;  %s1379_s3 = smov [#allocation2]  }
 0x136   :  { %v1077_v26 = vadd.f32 %v1076_v0, %v1075_v27  ;;  %v882_v37 = vadd.f32 %v881_v51, %v880_v1  ;;  %v974_v17 = vmul.f32 %v2091_v53, %v2091_v53  ;;  %v975_v22 = vmul.f32 %v2056_v11, %v2056_v11  ;;  %s1130_s16 = sshll.u32 %s1379_s3, 4  ;;  %s1131_s16 = int_to_ptr.vmem [resolvable:$true] %s1130_s16 }
 0x137   :  { %v1088_v12 = vsel %vm723_vm2, %v973_v62, 0.0  ;;  %v893_v41 = vsel %vm723_vm2, %v2091_v53, 0.0  ;;  %v895_v4 = vsel %vm723_vm2, %v2056_v11, 0.0  ;;  %v976_v15 = vmul.f32 %v2060_v34, %v2060_v34  ;;  %s1357_s17 = scalar_lea.vmem %s1131_s16, 32  ;;  %p1362_p1 = scmp.lt.s32.totalorder %s1131_s16, %s1131_s16 }
 0x138   :  { %v884_v44 = vadd.f32 %v883_v35, %v882_v37  ;;  %v1079_v48 = vadd.f32 %v1078_v21, %v1077_v26  ;;  %v1090_v31 = vsel %vm723_vm2, %v974_v17, 0.0  ;;  %v1092_v10 = vsel %vm723_vm2, %v975_v22, 0.0  ;;  %p1358_p0 = scmp.ne.s32.totalorder %s1131_s16, %s1357_s17  ;;  %p1363_p2 = scmp.lt.s32.totalorder %s1357_s17, %s1357_s17 }
 0x139   :  { %v897_v55 = vsel %vm723_vm2, %v2060_v34, 0.0  ;;  %v977_v53 = vmul.f32 %v2116_v5, %v2116_v5  ;;  %v1094_v14 = vsel %vm723_vm2, %v976_v15, 0.0  ;;  %v899_v11 = vsel %vm723_vm2, %v2116_v5, 0.0 }
 0x13a   :  { %v1081_v36 = vadd.f32 %v1080_v42, %v1079_v48  ;;  %v886_v9 = vadd.f32 %v885_v47, %v884_v44  ;;  %v978_v6 = vmul.f32 %v2135_v58, %v2135_v58  ;;  %v979_v1 = vmul.f32 %v2093_v54, %v2093_v54  ;;  %p1364_p3 = por %p1363_p2, %p1362_p1 }
 0x13b   :  { %v1096_v34 = vsel %vm723_vm2, %v977_v53, 0.0  ;;  %v901_v27 = vsel %vm723_vm2, %v2135_v58, 0.0  ;;  %v903_v51 = vsel %vm723_vm2, %v2093_v54, 0.0  ;;  %v980_v5 = vmul.f32 %v2133_v2, %v2133_v2 }
 0x13c   :  { %v888_v19 = vadd.f32 %v887_v46, %v886_v9  ;;  %v1083_v13 = vadd.f32 %v1082_v49, %v1081_v36  ;;  %v1098_v30 = vsel %vm723_vm2, %v978_v6, 0.0  ;;  %v1100_v26 = vsel %vm723_vm2, %v979_v1, 0.0  ;;  %p1365_p4 = pnand %p1364_p3, %p1358_p0 }
 0x13d   :  { %v905_v37 = vsel %vm723_vm2, %v2133_v2, 0.0  ;;  %v981_v58 = vmul.f32 %v2166_v43, %v2166_v43  ;;  %v1102_v44 = vsel %vm723_vm2, %v980_v5, 0.0  ;;  %v907_v54 = vsel %vm723_vm2, %v2166_v43, 0.0 }
 0x13e   :  { %v1085_v40 = vadd.f32 %v1084_v33, %v1083_v13  ;;  %v890_v56 = vadd.f32 %v889_v52, %v888_v19  ;;  %v982_v48 = vmul.f32 %v720_v32, %v720_v32  ;;  %v983_v42 = vmul.f32 %v2137_v20, %v2137_v20 }
 0x13f   :  { %v1104_v47 = vsel %vm723_vm2, %v981_v58, 0.0  ;;  %v909_v2 = vsel %vm723_vm2, %v720_v32, 0.0  ;;  %v911_v46 = vsel %vm723_vm2, %v2137_v20, 0.0  ;;  %v984_v28 = vmul.f32 %v2168_v7, %v2168_v7 }
 0x140   :  { %v892_v29 = vadd.f32 %v891_v59, %v890_v56  ;;  %v1087_v61 = vadd.f32 %v1086_v57, %v1085_v40  ;;  %v1106_v43 = vsel %vm723_vm2, %v982_v48, 0.0  ;;  %v1108_v13 = vsel %vm723_vm2, %v983_v42, 0.0 }
 0x141   :  { %v913_v33 = vsel %vm723_vm2, %v2168_v7, 0.0  ;;  %v1110_v32 = vsel %vm723_vm2, %v984_v28, 0.0 }
 0x142   :  { %v1089_v3 = vadd.f32 %v1088_v12, %v1087_v61  ;;  %v894_v16 = vadd.f32 %v893_v41, %v892_v29 }
 0x144   :  { %v896_v39 = vadd.f32 %v895_v4, %v894_v16  ;;  %v1091_v25 = vadd.f32 %v1090_v31, %v1089_v3 }
 0x146   :  { %v1093_v8 = vadd.f32 %v1092_v10, %v1091_v25  ;;  %v898_v23 = vadd.f32 %v897_v55, %v896_v39 }
 0x148   :  { %v900_v18 = vadd.f32 %v899_v11, %v898_v23  ;;  %v1095_v24 = vadd.f32 %v1094_v14, %v1093_v8 }
 0x14a   :  { %v1097_v50 = vadd.f32 %v1096_v34, %v1095_v24  ;;  %v902_v0 = vadd.f32 %v901_v27, %v900_v18 }
 0x14c   :  { %v904_v60 = vadd.f32 %v903_v51, %v902_v0  ;;  %v1099_v21 = vadd.f32 %v1098_v30, %v1097_v50 }
 0x14e   :  { %v1101_v35 = vadd.f32 %v1100_v26, %v1099_v21  ;;  %v906_v38 = vadd.f32 %v905_v37, %v904_v60 }
 0x150   :  { %v908_v45 = vadd.f32 %v907_v54, %v906_v38  ;;  %v1103_v63 = vadd.f32 %v1102_v44, %v1101_v35 }
 0x152   :  { %v1105_v36 = vadd.f32 %v1104_v47, %v1103_v63  ;;  %v910_v9 = vadd.f32 %v909_v2, %v908_v45 }
 0x154   :  { %v912_v49 = vadd.f32 %v911_v46, %v910_v9  ;;  %v1107_v19 = vadd.f32 %v1106_v43, %v1105_v36 }
 0x156   :  { %v914_v52 = vadd.f32 %v913_v33, %v912_v49  ;;  %v1109_v62 = vadd.f32 %v1108_v13, %v1107_v19 }
 0x158   :  { %v915_v40 = vrot.slane %v914_v52, 4  ;;  %v1111_v56 = vadd.f32 %v1110_v32, %v1109_v62 }
 0x15a   :  { %v916_v57 = vadd.f32 %v915_v40, %v914_v52  ;;  %v1112_v20 = vrot.slane %v1111_v56, 4 }
 0x15c   :  { %v917_v59 = vrot.slane %v916_v57, 2  ;;  %v1113_v17 = vadd.f32 %v1112_v20, %v1111_v56 }
 0x15e   :  { %v918_v29 = vadd.f32 %v917_v59, %v916_v57  ;;  %v1114_v61 = vrot.slane %v1113_v17, 2 }
 0x160   :  { %v919_v22 = vrot.slane %v918_v29, 1  ;;  %v1115_v12 = vadd.f32 %v1114_v61, %v1113_v17 }
 0x162   :  { %v1116_v41 = vrot.slane %v1115_v12, 1  ;;  %v920_v3 = vadd.f32 %v919_v22, %v918_v29 }
 0x164   :  { %v1117_v7 = vadd.f32 %v1116_v41, %v1115_v12 }
 0x166   :  { %v1119_v16 = vsel %vm1118_vm3, %v920_v3, %v1117_v7 }
 0x167   :  { %1121 = vst.msk [vmem:[#allocation2] sm:$0x3] %vm1120_vm4, %v1119_v16 }
 0x168   :  { %1368 = shalt.err (!%p1365_p4)
}
 0x169   :  { %1133 = dma.vmem_to_hbm [thread:$0]  %s1131_s16, 32, %s2263_s4, [#allocation3]  }
 0x16a   :  { %1377 = dma.done.wait [#allocation3], 32  }
 0x16b   :  { %1378 = vsyncadd [#allocation3], 4294967264 }
 0x16c   :  { %1139 = vsyncpa [#allocation3], 1 }

</bundles_post_ra>
